<compile_context>
chip_gen: v6e
topology: v6e:2x2x1
jax: 0.10.0
libtpu: 0.0.40
codegen_flags: <defaults>
</compile_context>

<pallas_src>
import functools

import jax
import jax.numpy as jnp
from jax.experimental import pallas as pl
from jax.experimental.pallas import tpu as pltpu


# ---------------------------------------------------------------------------
# Kernels
# ---------------------------------------------------------------------------
def _decoder_single_kernel(z_ref, w1_ref, b1_ref, w2_ref, b2_ref, out_ref,
                           *, batch, padded_batch):
    """Whole batch in one tile: fc1 + ReLU + BN(batch stats) + fc2 in a single body."""
    h = jnp.dot(z_ref[...], w1_ref[...], preferred_element_type=jnp.float32)
    h = jnp.maximum(h + b1_ref[...], 0.0)                      # [Bp, H] f32

    if padded_batch != batch:
        row = jax.lax.broadcasted_iota(jnp.int32, (padded_batch, 1), 0)
        valid = row < batch
        hs = jnp.where(valid, h, 0.0)
    else:
        valid = None
        hs = h

    inv_b = 1.0 / batch
    mean = jnp.sum(hs, axis=0, keepdims=True) * inv_b          # [1, H]
    # Centered (two-pass) variance: h is already resident, so this is cheap and avoids the
    # E[h^2] - mean^2 cancellation issue flagged in the review.
    d = h - mean
    if valid is not None:
        d = jnp.where(valid, d, 0.0)
    var = jnp.sum(d * d, axis=0, keepdims=True) * inv_b        # biased variance
    inv_std = jax.lax.rsqrt(var + 1e-5)

    h_norm = (h - mean) * inv_std                              # BN affine folded into w2'/b2'
    out_ref[...] = (jnp.dot(h_norm.astype(w2_ref.dtype), w2_ref[...],
                            preferred_element_type=jnp.float32) + b2_ref[...])


def _decoder_multi_kernel(z_ref, w1_ref, b1_ref, w2_ref, b2_ref, out_ref,
                          sum_ref, sumsq_ref, *h_scratch,
                          batch, tb, nb, mask_needed):
    """Two-pass path: pass 0 = fc1 + batch stats (+ stash h), pass 1 = normalize + fc2."""
    stash = bool(h_scratch)
    h_ref = h_scratch[0] if stash else None

    p = pl.program_id(0)          # 0: stats pass, 1: normalize + fc2 pass
    i = pl.program_id(1)          # batch-tile index

    @pl.when(jnp.logical_and(p == 0, i == 0))
    def _init_stats():
        sum_ref[...] = jnp.zeros_like(sum_ref)
        sumsq_ref[...] = jnp.zeros_like(sumsq_ref)

    def _fc1():
        h = jnp.dot(z_ref[...], w1_ref[...], preferred_element_type=jnp.float32)
        return jnp.maximum(h + b1_ref[...], 0.0)

    @pl.when(p == 0)
    def _stats_pass():
        h = _fc1()
        if stash:
            off = pl.multiple_of(i * tb, tb)
            h_ref[pl.ds(off, tb), :] = h

        def _accum(hm):
            sum_ref[...] += jnp.sum(hm, axis=0, keepdims=True)
            sumsq_ref[...] += jnp.sum(hm * hm, axis=0, keepdims=True)

        if mask_needed:
            # Only the last batch tile can contain zero-padded rows (h = relu(b1) there).
            @pl.when(i == nb - 1)
            def _masked():
                row = jax.lax.broadcasted_iota(jnp.int32, (tb, 1), 0) + i * tb
                _accum(jnp.where(row < batch, h, 0.0))

            @pl.when(i < nb - 1)
            def _unmasked():
                _accum(h)
        else:
            _accum(h)
        # No output write in pass 0: out block 0 is only flushed after pass-1 i=0 fills it.

    @pl.when(p == 1)
    def _fc2_pass():
        if stash:
            off = pl.multiple_of(i * tb, tb)
            h = h_ref[pl.ds(off, tb), :]
        else:
            h = _fc1()          # fallback when the h stash does not fit the VMEM budget
        inv_b = 1.0 / batch
        mean = sum_ref[...] * inv_b                                    # [1, H]
        # NOTE: E[h^2]-mean^2 is cancellation-prone for huge batches; fine at these scales.
        var = jnp.maximum(sumsq_ref[...] * inv_b - mean * mean, 0.0)   # biased variance
        inv_std = jax.lax.rsqrt(var + 1e-5)
        h_norm = (h - mean) * inv_std          # BN affine already folded into w2'/b2'
        out_ref[...] = (jnp.dot(h_norm.astype(w2_ref.dtype), w2_ref[...],
                                preferred_element_type=jnp.float32) + b2_ref[...])


# ---------------------------------------------------------------------------
# Wrapper
# ---------------------------------------------------------------------------
def _compiler_params(dimension_semantics, est_vmem_bytes):
    kwargs = dict(dimension_semantics=dimension_semantics)
    # Default scoped VMEM (~32 MiB) is plenty at module-realistic sizes; only raise when the
    # estimated footprint says we must (v7x: pick a smaller tile_b if est exceeds ~56 MiB).
    if est_vmem_bytes > (28 << 20):
        kwargs["vmem_limit_bytes"] = int(min(est_vmem_bytes + (4 << 20), 112 << 20))
    return pltpu.CompilerParams(**kwargs)


def bernoulli_decoder_forward(z, w1, b1, gamma, beta, w2, b2, *,
                              tile_b=512,
                              fc1_dtype=jnp.float32,
                              fc2_dtype=jnp.bfloat16,
                              h_scratch_budget=8 << 20):
    """z: [B, z_dim] f32. Weights stored transposed vs torch: w1 [z_dim,512], w2 [512,x_dim];
    b1/gamma/beta: [1,512] (or flat); b2: [1,x_dim] (or flat).
    fc1 runs in fc1_dtype (f32 default: exact BN statistics, negligible work since K=z_dim);
    fc2 operands run in fc2_dtype (bf16 default for v5e/v6e/v7x MXU throughput), f32 accum."""
    B, z_dim = z.shape
    hidden = w1.shape[1]
    x_dim = w2.shape[1]

    # --- Fold BatchNorm affine into fc2 (exact algebra, done once in f32). ---
    w2f = gamma.reshape(-1, 1).astype(jnp.float32) * w2.astype(jnp.float32)      # [H, x_dim]
    b2f = (beta.reshape(1, -1).astype(jnp.float32) @ w2.astype(jnp.float32)
           + b2.reshape(1, -1).astype(jnp.float32))                              # [1, x_dim]

    # --- Pad output features to a lane multiple (lane-dense stores / full MXU columns). ---
    lane_mult = 256 if (x_dim >= 256 and B >= 1024) else 128   # 256 only when fc2 is MXU-bound
    n_pad = -(-x_dim // lane_mult) * lane_mult
    if n_pad != x_dim:
        w2f = jnp.pad(w2f, ((0, 0), (0, n_pad - x_dim)))
        b2f = jnp.pad(b2f, ((0, 0), (0, n_pad - x_dim)))

    # --- Batch tiling (tile rows a multiple of 8 sublanes). ---
    b_round = -(-B // 8) * 8
    tb = min(max(8, tile_b - tile_b % 8), b_round)
    b_pad = -(-B // tb) * tb
    if b_pad != B:
        z = jnp.pad(z, ((0, b_pad - B), (0, 0)))
    nb = b_pad // tb

    # --- Operand dtypes. ---
    z_in = z.astype(fc1_dtype)
    w1_in = w1.astype(fc1_dtype)
    w2_in = w2f.astype(fc2_dtype)
    b1_in = b1.reshape(1, hidden).astype(jnp.float32)
    b2_in = b2f.astype(jnp.float32)

    weight_bytes = (int(w1_in.size) * w1_in.dtype.itemsize
                    + int(b1_in.size) * 4
                    + int(w2_in.size) * w2_in.dtype.itemsize
                    + int(b2_in.size) * 4)
    # v7x VMEM guard: single-buffer the constant-index weight blocks only when they are big
    # enough to matter (keeps the small-size configuration identical to the validated one).
    single_buffer_weights = weight_bytes > (4 << 20)
    wspec_kwargs = ({"pipeline_mode": pl.Buffered(1)} if single_buffer_weights else {})
    buf_w = 1 if single_buffer_weights else 2

    if nb == 1:
        # ------------------- single-pass fast path (B <= tile_b) -------------------
        est_vmem = (buf_w * weight_bytes
                    + 2 * int(z_in.size) * z_in.dtype.itemsize
                    + 2 * b_pad * n_pad * 4)
        kernel = functools.partial(_decoder_single_kernel, batch=B, padded_batch=b_pad)
        out = pl.pallas_call(
            kernel,
            out_shape=jax.ShapeDtypeStruct((b_pad, n_pad), jnp.float32),
            grid_spec=pltpu.PrefetchScalarGridSpec(
                num_scalar_prefetch=0,
                grid=(1,),
                in_specs=[
                    pl.BlockSpec((b_pad, z_dim), lambda i: (0, 0)),
                    pl.BlockSpec((z_dim, hidden), lambda i: (0, 0), **wspec_kwargs),
                    pl.BlockSpec((1, hidden), lambda i: (0, 0), **wspec_kwargs),
                    pl.BlockSpec((hidden, n_pad), lambda i: (0, 0), **wspec_kwargs),
                    pl.BlockSpec((1, n_pad), lambda i: (0, 0), **wspec_kwargs),
                ],
                out_specs=pl.BlockSpec((b_pad, n_pad), lambda i: (0, 0)),
            ),
            compiler_params=_compiler_params(("arbitrary",), est_vmem),
        )(z_in, w1_in, b1_in, w2_in, b2_in)
        return out[:B, :x_dim]

    # ----------------------- multi-tile two-pass path (nb > 1) -----------------------
    stash_h = (b_pad * hidden * 4) <= h_scratch_budget
    scratch = [pltpu.VMEM((1, hidden), jnp.float32),    # sum(h)   over the full batch
               pltpu.VMEM((1, hidden), jnp.float32)]    # sum(h^2) over the full batch
    if stash_h:
        scratch.append(pltpu.VMEM((b_pad, hidden), jnp.float32))   # stashed fc1 activations
        z_map = lambda p, i: (i * (1 - p), 0)   # pass 1 never needs new z tiles
    else:
        z_map = lambda p, i: (i, 0)             # fallback: fc1 recomputed in pass 1

    est_vmem = (buf_w * weight_bytes
                + 2 * tb * z_dim * z_in.dtype.itemsize
                + 2 * tb * n_pad * 4
                + 2 * hidden * 4
                + (b_pad * hidden * 4 if stash_h else 0))

    kernel = functools.partial(_decoder_multi_kernel, batch=B, tb=tb, nb=nb,
                               mask_needed=(b_pad != B))

    out = pl.pallas_call(
        kernel,
        out_shape=jax.ShapeDtypeStruct((b_pad, n_pad), jnp.float32),
        grid_spec=pltpu.PrefetchScalarGridSpec(
            num_scalar_prefetch=0,
            grid=(2, nb),                                            # (pass, batch tile)
            in_specs=[
                pl.BlockSpec((tb, z_dim), z_map),                    # z tile (pipelined)
                pl.BlockSpec((z_dim, hidden), lambda p, i: (0, 0), **wspec_kwargs),
                pl.BlockSpec((1, hidden), lambda p, i: (0, 0), **wspec_kwargs),
                pl.BlockSpec((hidden, n_pad), lambda p, i: (0, 0), **wspec_kwargs),
                pl.BlockSpec((1, n_pad), lambda p, i: (0, 0), **wspec_kwargs),
            ],
            # All pass-0 steps alias output block 0; pass-1 i=0 fully overwrites it before
            # the first index change, so no zero/placeholder writeback ever reaches HBM.
            out_specs=pl.BlockSpec((tb, n_pad), lambda p, i: (i * p, 0)),
            scratch_shapes=scratch,
        ),
        # Both axes carry state (pass ordering; stats accumulator across tiles).
        compiler_params=_compiler_params(("arbitrary", "arbitrary"), est_vmem),
    )(z_in, w1_in, b1_in, w2_in, b2_in)

    return out[:B, :x_dim]


# ---------------------------------------------------------------------------
# Reference + test
# ---------------------------------------------------------------------------
def _init_params(key, z_dim, hidden, x_dim):
    """Deterministic init mimicking torch defaults (uniform +-1/sqrt(fan_in))."""
    k1, k2, k3, k4 = jax.random.split(key, 4)
    lim1 = 1.0 / jnp.sqrt(jnp.float32(z_dim))
    lim2 = 1.0 / jnp.sqrt(jnp.float32(hidden))
    # stored as [in, out] (i.e. torch weight transposed)
    w1 = jax.random.uniform(k1, (z_dim, hidden), jnp.float32, -lim1, lim1)
    b1 = jax.random.uniform(k2, (1, hidden), jnp.float32, -lim1, lim1)
    w2 = jax.random.uniform(k3, (hidden, x_dim), jnp.float32, -lim2, lim2)
    b2 = jax.random.uniform(k4, (1, x_dim), jnp.float32, -lim2, lim2)
    gamma = jnp.ones((1, hidden), jnp.float32)   # bn1.weight init = 1
    beta = jnp.zeros((1, hidden), jnp.float32)   # bn1.bias init = 0
    return w1, b1, gamma, beta, w2, b2


def _reference(z, w1, b1, gamma, beta, w2, b2):
    h = jnp.maximum(z @ w1 + b1, 0.0)
    mean = jnp.mean(h, axis=0, keepdims=True)
    var = jnp.mean((h - mean) ** 2, axis=0, keepdims=True)
    h = (h - mean) / jnp.sqrt(var + 1e-5) * gamma + beta
    return h @ w2 + b2


if __name__ == "__main__":
    B, Z_DIM, HIDDEN, X_DIM = 8, 32, 512, 64

    key = jax.random.PRNGKey(0)
    k_z, k_z2, k_z3, k_p = jax.random.split(key, 4)
    z = jax.random.normal(k_z, (B, Z_DIM), jnp.float32)
    params = _init_params(k_p, Z_DIM, HIDDEN, X_DIM)
    ref = _reference(z, *params)

    # 1) Single-pass fast path, f32 fc2: exact training-mode BN semantics.
    out = jax.block_until_ready(
        bernoulli_decoder_forward(z, *params, fc2_dtype=jnp.float32))
    assert out.shape == (B, X_DIM)
    assert jnp.allclose(out, ref, atol=1e-4, rtol=1e-4)

    # 2) Default config: bf16 fc2 operands (perf-review default), f32 fc1 / BN math.
    out_bf16 = jax.block_until_ready(bernoulli_decoder_forward(z, *params))
    assert out_bf16.shape == (B, X_DIM)
    assert jnp.allclose(out_bf16, ref, atol=3e-2, rtol=3e-2)

    # 3) Single-pass path with a batch needing sublane padding (in-kernel row mask).
    B3 = 10
    z3 = jax.random.normal(k_z3, (B3, Z_DIM), jnp.float32)
    out3 = jax.block_until_ready(
        bernoulli_decoder_forward(z3, *params, fc2_dtype=jnp.float32))
    assert out3.shape == (B3, X_DIM)
    assert jnp.allclose(out3, _reference(z3, *params), atol=1e-4, rtol=1e-4)

    # 4) Multi-tile two-pass path, h stashed in VMEM (no fc1 recompute, no pass-0 writeback).
    B2 = 200
    z2 = jax.random.normal(k_z2, (B2, Z_DIM), jnp.float32)
    ref2 = _reference(z2, *params)
    out2 = jax.block_until_ready(
        bernoulli_decoder_forward(z2, *params, tile_b=64, fc2_dtype=jnp.float32))
    assert out2.shape == (B2, X_DIM)
    assert jnp.allclose(out2, ref2, atol=1e-3, rtol=1e-3)

    # 5) Multi-tile fallback path (h scratch disabled -> fc1 recomputed in pass 1).
    out2b = jax.block_until_ready(
        bernoulli_decoder_forward(z2, *params, tile_b=64, fc2_dtype=jnp.float32,
                                  h_scratch_budget=0))
    assert jnp.allclose(out2b, ref2, atol=1e-3, rtol=1e-3)

    print("KERNEL_OK")
</pallas_src>

<mosaic_0001>
module attributes {stable_mosaic.version = 11 : i64} {
  func.func @_decoder_single_kernel(%arg0: i32, %arg1: memref<8x32xf32, #tpu.memory_space<vmem>>, %arg2: memref<32x512xf32, #tpu.memory_space<vmem>>, %arg3: memref<1x512xf32, #tpu.memory_space<vmem>>, %arg4: memref<512x128xf32, #tpu.memory_space<vmem>>, %arg5: memref<1x128xf32, #tpu.memory_space<vmem>>, %arg6: memref<8x128xf32, #tpu.memory_space<vmem>>) attributes {dimension_semantics = [#tpu.dimension_semantics<arbitrary>], iteration_bounds = array<i64: 1>, scalar_prefetch = 0 : i64, scratch_operands = 0 : i64, tpu.core_type = #tpu.core_type<tc>, window_params = [{pipeline_mode = #tpu.pipeline_mode<synchronous>, transform_indices = @transform_0, window_bounds = array<i64: 8, 32>}, {pipeline_mode = #tpu.pipeline_mode<synchronous>, transform_indices = @transform_1, window_bounds = array<i64: 32, 512>}, {pipeline_mode = #tpu.pipeline_mode<synchronous>, transform_indices = @transform_2, window_bounds = array<i64: 1, 512>}, {pipeline_mode = #tpu.pipeline_mode<synchronous>, transform_indices = @transform_3, window_bounds = array<i64: 512, 128>}, {pipeline_mode = #tpu.pipeline_mode<synchronous>, transform_indices = @transform_4, window_bounds = array<i64: 1, 128>}, {pipeline_mode = #tpu.pipeline_mode<synchronous>, transform_indices = @transform_5, window_bounds = array<i64: 8, 128>}]} {
    %c0 = arith.constant 0 : index
    %c0_0 = arith.constant 0 : index
    %0 = vector.load %arg1[%c0, %c0_0] : memref<8x32xf32, #tpu.memory_space<vmem>>, vector<8x32xf32>
    %c0_1 = arith.constant 0 : index
    %c0_2 = arith.constant 0 : index
    %1 = vector.load %arg2[%c0_1, %c0_2] : memref<32x512xf32, #tpu.memory_space<vmem>>, vector<32x512xf32>
    %cst = arith.constant dense<0.000000e+00> : vector<8x512xf32>
    %2 = tpu.matmul %0, %1, %cst {dimension_numbers = #tpu.dot_dimension_numbers<[1], [0], [0], [1], [0, 0, 1, 1], [], []>} : vector<8x32xf32>, vector<32x512xf32>, vector<8x512xf32> -> vector<8x512xf32>
    %c0_3 = arith.constant 0 : index
    %c0_4 = arith.constant 0 : index
    %3 = vector.load %arg3[%c0_3, %c0_4] : memref<1x512xf32, #tpu.memory_space<vmem>>, vector<1x512xf32>
    %4 = vector.broadcast %3 : vector<1x512xf32> to vector<8x512xf32>
    %5 = arith.addf %2, %4 : vector<8x512xf32>
    %cst_5 = arith.constant 0.000000e+00 : f32
    %6 = vector.broadcast %cst_5 : f32 to vector<8x512xf32>
    %7 = arith.maximumf %5, %6 : vector<8x512xf32>
    %cst_6 = arith.constant dense<0.000000e+00> : vector<512xf32>
    %8 = vector.multi_reduction <add>, %7, %cst_6 [0] : vector<8x512xf32> to vector<512xf32>
    %9 = vector.shape_cast %8 : vector<512xf32> to vector<1x512xf32>
    %cst_7 = arith.constant 1.250000e-01 : f32
    %10 = vector.broadcast %cst_7 : f32 to vector<1x512xf32>
    %11 = arith.mulf %9, %10 : vector<1x512xf32>
    %12 = vector.broadcast %11 : vector<1x512xf32> to vector<8x512xf32>
    %13 = arith.subf %7, %12 : vector<8x512xf32>
    %14 = arith.mulf %13, %13 : vector<8x512xf32>
    %cst_8 = arith.constant dense<0.000000e+00> : vector<512xf32>
    %15 = vector.multi_reduction <add>, %14, %cst_8 [0] : vector<8x512xf32> to vector<512xf32>
    %16 = vector.shape_cast %15 : vector<512xf32> to vector<1x512xf32>
    %cst_9 = arith.constant 1.250000e-01 : f32
    %17 = vector.broadcast %cst_9 : f32 to vector<1x512xf32>
    %18 = arith.mulf %16, %17 : vector<1x512xf32>
    %cst_10 = arith.constant 9.99999974E-6 : f32
    %19 = vector.broadcast %cst_10 : f32 to vector<1x512xf32>
    %20 = arith.addf %18, %19 : vector<1x512xf32>
    %21 = math.rsqrt %20 : vector<1x512xf32>
    %22 = vector.broadcast %11 : vector<1x512xf32> to vector<8x512xf32>
    %23 = arith.subf %7, %22 : vector<8x512xf32>
    %24 = vector.broadcast %21 : vector<1x512xf32> to vector<8x512xf32>
    %25 = arith.mulf %23, %24 : vector<8x512xf32>
    %c0_11 = arith.constant 0 : index
    %c0_12 = arith.constant 0 : index
    %26 = vector.load %arg4[%c0_11, %c0_12] : memref<512x128xf32, #tpu.memory_space<vmem>>, vector<512x128xf32>
    %cst_13 = arith.constant dense<0.000000e+00> : vector<8x128xf32>
    %27 = tpu.matmul %25, %26, %cst_13 {dimension_numbers = #tpu.dot_dimension_numbers<[1], [0], [0], [1], [0, 0, 1, 1], [], []>} : vector<8x512xf32>, vector<512x128xf32>, vector<8x128xf32> -> vector<8x128xf32>
    %c0_14 = arith.constant 0 : index
    %c0_15 = arith.constant 0 : index
    %28 = vector.load %arg5[%c0_14, %c0_15] : memref<1x128xf32, #tpu.memory_space<vmem>>, vector<1x128xf32>
    %29 = vector.broadcast %28 : vector<1x128xf32> to vector<8x128xf32>
    %30 = arith.addf %27, %29 : vector<8x128xf32>
    %c0_16 = arith.constant 0 : index
    %c0_17 = arith.constant 0 : index
    %31 = vector.load %arg6[%c0_16, %c0_17] : memref<8x128xf32, #tpu.memory_space<vmem>>, vector<8x128xf32>
    tpu.vector_store %arg6[%c0_16, %c0_17], %30 {strides = array<i32>} : memref<8x128xf32, #tpu.memory_space<vmem>>, vector<8x128xf32>,
    return
  }
  func.func @transform_0(%arg0: i32) -> (i32, i32) {
    %c0_i32 = arith.constant 0 : i32
    %c0_i32_0 = arith.constant 0 : i32
    %c0_i32_1 = arith.constant 0 : i32
    return %c0_i32, %c0_i32_0 : i32, i32
  }
  func.func @transform_1(%arg0: i32) -> (i32, i32) {
    %c0_i32 = arith.constant 0 : i32
    %c0_i32_0 = arith.constant 0 : i32
    %c0_i32_1 = arith.constant 0 : i32
    return %c0_i32, %c0_i32_0 : i32, i32
  }
  func.func @transform_2(%arg0: i32) -> (i32, i32) {
    %c0_i32 = arith.constant 0 : i32
    %c0_i32_0 = arith.constant 0 : i32
    %c0_i32_1 = arith.constant 0 : i32
    return %c0_i32, %c0_i32_0 : i32, i32
  }
  func.func @transform_3(%arg0: i32) -> (i32, i32) {
    %c0_i32 = arith.constant 0 : i32
    %c0_i32_0 = arith.constant 0 : i32
    %c0_i32_1 = arith.constant 0 : i32
    return %c0_i32, %c0_i32_0 : i32, i32
  }
  func.func @transform_4(%arg0: i32) -> (i32, i32) {
    %c0_i32 = arith.constant 0 : i32
    %c0_i32_0 = arith.constant 0 : i32
    %c0_i32_1 = arith.constant 0 : i32
    return %c0_i32, %c0_i32_0 : i32, i32
  }
  func.func @transform_5(%arg0: i32) -> (i32, i32) {
    %c0_i32 = arith.constant 0 : i32
    %c0_i32_0 = arith.constant 0 : i32
    %c0_i32_1 = arith.constant 0 : i32
    return %c0_i32, %c0_i32_0 : i32, i32
  }
}

</mosaic_0001>

<bundles_post_ra>
// kernel: tpu_custom_call.1
= control target key start
LH: loop header
LB: loop body
LE: loop exit
PB: predicated region body
PF: predicated region fallthrough
CT: control target
= control target key end

     0   :  { %10 = vsyncpa [#allocation3], 0  ;;  %s823_s0 = inlined_call_operand.hbm [shape: f32[8,32], index: 0, kind: input, shape index: {}]   ;;  %s824_s1 = inlined_call_operand.hbm [shape: f32[32,512], index: 1, kind: input, shape index: {}]   ;;  %s825_s2 = inlined_call_operand.hbm [shape: f32[1,512], index: 2, kind: input, shape index: {}]   ;;  %s826_s3 = inlined_call_operand.hbm [shape: f32[512,128], index: 3, kind: input, shape index: {}]   ;;  %s827_s4 = inlined_call_operand.vmem [shape: f32[1,128], index: 4, kind: input, shape index: {}]   ;;  %s828_s5 = inlined_call_operand.hbm [shape: f32[8,128], index: 5, kind: output, shape index: {}]  }
   0x1   :  { %11 = vsyncpa [#allocation6], 0 }
   0x2   :  { %12 = vsyncpa [#allocation9], 0 }
   0x3   :  { %13 = vsyncpa [#allocation4], 0  ;;  %s765_s18 = smov [#allocation5]  }
   0x4   :  { %s29_s19 = sshll.u32 %s765_s18, 4  ;;  %s30_s19 = int_to_ptr.vmem [resolvable:$true] %s29_s19 }
   0x5   :  { %s665_s20 = scalar_lea.vmem %s30_s19, 2048  ;;  %p670_p1 = scmp.lt.s32.totalorder %s30_s19, %s30_s19 }
   0x6   :  { %p666_p0 = scmp.ne.s32.totalorder %s30_s19, %s665_s20  ;;  %p671_p2 = scmp.lt.s32.totalorder %s665_s20, %s665_s20 }
   0x8   :  { %p672_p3 = por %p671_p2, %p670_p1 }
   0xa   :  { %p673_p4 = pnand %p672_p3, %p666_p0 }
   0xc   :  { %676 = shalt.err (!%p673_p4)
}
   0xd   :  { %s766_s21 = smov 512   ;;  %s767_s22 = smov 32  }
   0xe   :  { %35 = dma.hbm_to_vmem [thread:$0]  %s824_s1, 2048, %s30_s19, [#allocation6], %s766_s21, %s766_s21, %s767_s22  }
   0xf   :  { %s768_s25 = smov [#allocation2]   ;;  %s769_s27 = smov [#allocation7]  }
  0x10   :  { %s20_s26 = sshll.u32 %s768_s25, 4  ;;  %s42_s28 = sshll.u32 %s769_s27, 4  ;;  %s21_s26 = int_to_ptr.vmem [resolvable:$true] %s20_s26  ;;  %s43_s28 = int_to_ptr.vmem [resolvable:$true] %s42_s28 }
  0x11   :  { %s685_s29 = scalar_lea.vmem %s21_s26, 128  ;;  %p690_p6 = scmp.lt.s32.totalorder %s21_s26, %s21_s26 }
  0x12   :  { %p686_p5 = scmp.ne.s32.totalorder %s21_s26, %s685_s29  ;;  %p691_p7 = scmp.lt.s32.totalorder %s685_s29, %s685_s29 }
  0x14   :  { %p692_p8 = por %p691_p7, %p690_p6 }
  0x16   :  { %p693_p9 = pnand %p692_p8, %p686_p5 }
  0x18   :  { %696 = shalt.err (!%p693_p9)
}
  0x19   :  { %23 = dma.hbm_to_vmem [thread:$0]  %s823_s0, 128, %s21_s26, [#allocation3]  }
  0x1a   :  { %s705_s7 = scalar_lea.vmem %s43_s28, 64  ;;  %p710_p11 = scmp.lt.s32.totalorder %s43_s28, %s43_s28 }
  0x1b   :  { %p706_p10 = scmp.ne.s32.totalorder %s43_s28, %s705_s7  ;;  %p711_p12 = scmp.lt.s32.totalorder %s705_s7, %s705_s7 }
  0x1d   :  { %p712_p13 = por %p711_p12, %p710_p11 }
  0x1f   :  { %p713_p0 = pnand %p712_p13, %p706_p10 }
  0x21   :  { %716 = shalt.err (!%p713_p0)
}
  0x22   :  { %45 = dma.hbm_to_vmem [thread:$0]  %s825_s2, 64, %s43_s28, [#allocation6]  }
  0x23   :  { %s770_s9 = smov [#allocation8]  }
  0x24   :  { %s51_s10 = sshll.u32 %s770_s9, 4  ;;  %s52_s10 = int_to_ptr.vmem [resolvable:$true] %s51_s10 }
  0x25   :  { %s725_s11 = scalar_lea.vmem %s52_s10, 8192  ;;  %p730_p2 = scmp.lt.s32.totalorder %s52_s10, %s52_s10 }
  0x26   :  { %p726_p1 = scmp.ne.s32.totalorder %s52_s10, %s725_s11  ;;  %p731_p3 = scmp.lt.s32.totalorder %s725_s11, %s725_s11 }
  0x28   :  { %p732_p4 = por %p731_p3, %p730_p2 }
  0x2a   :  { %p733_p5 = pnand %p732_p4, %p726_p1 }
  0x2c   :  { %736 = shalt.err (!%p733_p5)
}
  0x2d   :  { %s771_s0 = smov 128   ;;  %s772_s12 = smov 8  }
  0x2e   :  { %57 = dma.hbm_to_vmem [thread:$0]  %s826_s3, 8192, %s52_s10, [#allocation9], %s771_s0, %s771_s0, %s772_s12  }
  0x2f   :  { %757 = dma.done.wait [#allocation3], 128  }
  0x30   :  { %758 = vsyncadd [#allocation3], 4294967168 }
  0x31   :  { %759 = dma.done.wait [#allocation6], 2112  }
  0x32   :  { %760 = vsyncadd [#allocation6], 4294965184 }
  0x33   :  { %761 = dma.done.wait [#allocation9], 8192  }
  0x34   :  { %762 = vsyncadd [#allocation9], 4294959104  ;;  %v773_v0 = vmov 0.0   ;;  %v86_v1 = vld [vmem:[#allocation5 + $0x68] sm:$0xff]  ;;  %v88_v2 = vld [vmem:[#allocation5 + $0x78] sm:$0xff]  ;;  %vm111_vm0 = vcmask 261120  }
  0x35   :  { %179 = vmatprep.mubr.f32.mxu0 %v773_v0  ;;  %250 = vmatprep.mubr.f32.mxu1 %v773_v0  ;;  %v85_v3 = vld [vmem:[#allocation5 + $0x60] sm:$0xff]  ;;  %v87_v4 = vld [vmem:[#allocation5 + $0x70] sm:$0xff]  ;;  %v82_v5 = vld [vmem:[#allocation5 + $0x48] sm:$0xff]  ;;  %s774_s15 = smov [#allocation10]  }
  0x36   :  { %139 = vmatprep.subr.mxu0 %v86_v1  ;;  %210 = vmatprep.subr.mxu1 %v88_v2  ;;  %v84_v6 = vld [vmem:[#allocation5 + $0x58] sm:$0xff]  ;;  %v81_v7 = vld [vmem:[#allocation5 + $0x40] sm:$0xff]  ;;  %v83_v8 = vld [vmem:[#allocation5 + $0x50] sm:$0xff]  ;;  %s555_s16 = sshll.u32 %s774_s15, 4  ;;  %s556_s16 = int_to_ptr.vmem [resolvable:$true] %s555_s16 }
  0x37   :  { %140 = vmatpush1.msra.mxu0 %v85_v3  ;;  %211 = vmatpush1.msra.mxu1 %v87_v4  ;;  %v78_v9 = vld [vmem:[#allocation5 + $0x28] sm:$0xff]  ;;  %v80_v10 = vld [vmem:[#allocation5 + $0x38] sm:$0xff]  ;;  %v77_v11 = vld [vmem:[#allocation5 + $0x20] sm:$0xff]  ;;  %s737_s17 = scalar_lea.vmem %s556_s16, 128  ;;  %p742_p7 = scmp.lt.s32.totalorder %s556_s16, %s556_s16 }
  0x38   :  { %141 = vmatprep.subr.mxu0 %v82_v5  ;;  %212 = vmatprep.subr.mxu1 %v84_v6  ;;  %v79_v12 = vld [vmem:[#allocation5 + $0x30] sm:$0xff]  ;;  %v74_v13 = vld [vmem:[#allocation5 + $0x8] sm:$0xff]  ;;  %v76_v14 = vld [vmem:[#allocation5 + $0x18] sm:$0xff]  ;;  %p738_p6 = scmp.ne.s32.totalorder %s556_s16, %s737_s17  ;;  %p743_p8 = scmp.lt.s32.totalorder %s737_s17, %s737_s17 }
  0x39   :  { %142 = vmatpush1.msra.mxu0 %v81_v7  ;;  %213 = vmatpush1.msra.mxu1 %v83_v8  ;;  %v73_v15 = vld [vmem:[#allocation5] sm:$0xff]  ;;  %v75_v16 = vld [vmem:[#allocation5 + $0x10] sm:$0xff]  ;;  %v72_v17 = vld [vmem:[#allocation2] sm:$0xff] }
  0x3a   :  { %143 = vmatprep.subr.mxu0 %v78_v9  ;;  %214 = vmatprep.subr.mxu1 %v80_v10  ;;  %v368_v18 = vld [vmem:[#allocation8 + $0xf8] sm:$0xff]  ;;  %v367_v22 = vld [vmem:[#allocation8 + $0xf0] sm:$0xff]  ;;  %v366_v26 = vld [vmem:[#allocation8 + $0xe8] sm:$0xff]  ;;  %p744_p9 = por %p743_p8, %p742_p7 }
  0x3b   :  { %144 = vmatpush1.msra.mxu0 %v77_v11  ;;  %215 = vmatpush1.msra.mxu1 %v79_v12  ;;  %v400_v19 = vld [vmem:[#allocation8 + $0x1f8] sm:$0xff]  ;;  %v399_v23 = vld [vmem:[#allocation8 + $0x1f0] sm:$0xff]  ;;  %v398_v27 = vld [vmem:[#allocation8 + $0x1e8] sm:$0xff] }
  0x3c   :  { %145 = vmatprep.subr.mxu0 %v74_v13  ;;  %216 = vmatprep.subr.mxu1 %v76_v14  ;;  %v352_v20 = vld [vmem:[#allocation8 + $0x78] sm:$0xff]  ;;  %v351_v24 = vld [vmem:[#allocation8 + $0x70] sm:$0xff]  ;;  %v350_v28 = vld [vmem:[#allocation8 + $0x68] sm:$0xff]  ;;  %p745_p10 = pnand %p744_p9, %p738_p6 }
  0x3d   :  { %146 = vmatpush1.msra.mxu0 %v73_v15  ;;  %217 = vmatpush1.msra.mxu1 %v75_v16  ;;  %v384_v21 = vld [vmem:[#allocation8 + $0x178] sm:$0xff]  ;;  %v383_v25 = vld [vmem:[#allocation8 + $0x170] sm:$0xff]  ;;  %v382_v29 = vld [vmem:[#allocation8 + $0x168] sm:$0xff] }
  0x3e   :  { %566 = vmatmul.mubr.msk.f32.vlgmr.msra.gmra.mxu0 %vm111_vm0, %v72_v17  ;;  %567 = vmatmul.mubr.msk.f32.vlgmr.msra.gmra.mxu1 %vm111_vm0, %v72_v17  ;;  %v365_v30 = vld [vmem:[#allocation8 + $0xe0] sm:$0xff]  ;;  %v364_v34 = vld [vmem:[#allocation8 + $0xd8] sm:$0xff]  ;;  %v363_v38 = vld [vmem:[#allocation8 + $0xd0] sm:$0xff] }
  0x3f   :  { %569 = vmatprep.subr.mxu0 %v368_v18  ;;  %604 = vmatprep.subr.mxu1 %v400_v19  ;;  %v397_v31 = vld [vmem:[#allocation8 + $0x1e0] sm:$0xff]  ;;  %v396_v35 = vld [vmem:[#allocation8 + $0x1d8] sm:$0xff]  ;;  %v395_v39 = vld [vmem:[#allocation8 + $0x1d0] sm:$0xff]  ;;  %v91_v18 = vlaneseq }
  0x40   :  { %570 = vmatpush3.msra.mxu0 %v352_v20  ;;  %605 = vmatpush3.msra.mxu1 %v384_v21  ;;  %v349_v32 = vld [vmem:[#allocation8 + $0x60] sm:$0xff]  ;;  %v348_v36 = vld [vmem:[#allocation8 + $0x58] sm:$0xff]  ;;  %v347_v40 = vld [vmem:[#allocation8 + $0x50] sm:$0xff] }
  0x41   :  { %571 = vmatprep.subr.mxu0 %v367_v22  ;;  %606 = vmatprep.subr.mxu1 %v399_v23  ;;  %v381_v33 = vld [vmem:[#allocation8 + $0x160] sm:$0xff]  ;;  %v380_v37 = vld [vmem:[#allocation8 + $0x158] sm:$0xff]  ;;  %v379_v41 = vld [vmem:[#allocation8 + $0x150] sm:$0xff]  ;;  %v92_v19 = vshrl.u32 %v91_v18, 7 }
  0x42   :  { %572 = vmatpush3.msra.mxu0 %v351_v24  ;;  %607 = vmatpush3.msra.mxu1 %v383_v25  ;;  %v362_v42 = vld [vmem:[#allocation8 + $0xc8] sm:$0xff]  ;;  %v361_v46 = vld [vmem:[#allocation8 + $0xc0] sm:$0xff]  ;;  %v360_v50 = vld [vmem:[#allocation8 + $0xb8] sm:$0xff] }
  0x43   :  { %573 = vmatprep.subr.mxu0 %v366_v26  ;;  %608 = vmatprep.subr.mxu1 %v398_v27  ;;  %v394_v43 = vld [vmem:[#allocation8 + $0x1c8] sm:$0xff]  ;;  %v393_v47 = vld [vmem:[#allocation8 + $0x1c0] sm:$0xff]  ;;  %v392_v51 = vld [vmem:[#allocation8 + $0x1b8] sm:$0xff]  ;;  %v93_v20 = vsub.s32 0, %v92_v19  ;;  %v101_v21 = vsub.s32 2, %v92_v19  ;;  %v97_v23 = vsub.s32 1, %v92_v19 }
  0x44   :  { %574 = vmatpush3.msra.mxu0 %v350_v28  ;;  %609 = vmatpush3.msra.mxu1 %v382_v29  ;;  %v346_v44 = vld [vmem:[#allocation8 + $0x48] sm:$0xff]  ;;  %v345_v48 = vld [vmem:[#allocation8 + $0x40] sm:$0xff]  ;;  %v344_v52 = vld [vmem:[#allocation8 + $0x38] sm:$0xff]  ;;  %v105_v24 = vsub.s32 3, %v92_v19 }
  0x45   :  { %575 = vmatprep.subr.mxu0 %v365_v30  ;;  %610 = vmatprep.subr.mxu1 %v397_v31  ;;  %v378_v45 = vld [vmem:[#allocation8 + $0x148] sm:$0xff]  ;;  %v377_v49 = vld [vmem:[#allocation8 + $0x140] sm:$0xff]  ;;  %v376_v53 = vld [vmem:[#allocation8 + $0x138] sm:$0xff] }
  0x46   :  { %576 = vmatpush3.msra.mxu0 %v349_v32  ;;  %611 = vmatpush3.msra.mxu1 %v381_v33  ;;  %v359_v54 = vld [vmem:[#allocation8 + $0xb0] sm:$0xff]  ;;  %v358_v58 = vld [vmem:[#allocation8 + $0xa8] sm:$0xff]  ;;  %v357_v62 = vld [vmem:[#allocation8 + $0xa0] sm:$0xff] }
  0x47   :  { %577 = vmatprep.subr.mxu0 %v364_v34  ;;  %612 = vmatprep.subr.mxu1 %v396_v35  ;;  %v391_v55 = vld [vmem:[#allocation8 + $0x1b0] sm:$0xff]  ;;  %v390_v59 = vld [vmem:[#allocation8 + $0x1a8] sm:$0xff]  ;;  %v389_v63 = vld [vmem:[#allocation8 + $0x1a0] sm:$0xff] }
  0x48   :  { %578 = vmatpush3.msra.mxu0 %v348_v36  ;;  %613 = vmatpush3.msra.mxu1 %v380_v37  ;;  %v343_v56 = vld [vmem:[#allocation8 + $0x30] sm:$0xff]  ;;  %v342_v60 = vld [vmem:[#allocation8 + $0x28] sm:$0xff]  ;;  %v341_v0 = vld [vmem:[#allocation8 + $0x20] sm:$0xff] }
  0x49   :  { %579 = vmatprep.subr.mxu0 %v363_v38  ;;  %614 = vmatprep.subr.mxu1 %v395_v39  ;;  %v375_v57 = vld [vmem:[#allocation8 + $0x130] sm:$0xff]  ;;  %v374_v61 = vld [vmem:[#allocation8 + $0x128] sm:$0xff]  ;;  %v373_v1 = vld [vmem:[#allocation8 + $0x120] sm:$0xff] }
  0x4a   :  { %580 = vmatpush3.msra.mxu0 %v347_v40  ;;  %615 = vmatpush3.msra.mxu1 %v379_v41  ;;  %v356_v2 = vld [vmem:[#allocation8 + $0x98] sm:$0xff]  ;;  %v355_v6 = vld [vmem:[#allocation8 + $0x90] sm:$0xff]  ;;  %v354_v10 = vld [vmem:[#allocation8 + $0x88] sm:$0xff] }
  0x4b   :  { %581 = vmatprep.subr.mxu0 %v362_v42  ;;  %616 = vmatprep.subr.mxu1 %v394_v43  ;;  %v388_v3 = vld [vmem:[#allocation8 + $0x198] sm:$0xff]  ;;  %v387_v7 = vld [vmem:[#allocation8 + $0x190] sm:$0xff]  ;;  %v386_v11 = vld [vmem:[#allocation8 + $0x188] sm:$0xff] }
  0x4c   :  { %582 = vmatpush3.msra.mxu0 %v346_v44  ;;  %617 = vmatpush3.msra.mxu1 %v378_v45  ;;  %v340_v4 = vld [vmem:[#allocation8 + $0x18] sm:$0xff]  ;;  %v339_v8 = vld [vmem:[#allocation8 + $0x10] sm:$0xff]  ;;  %v338_v12 = vld [vmem:[#allocation8 + $0x8] sm:$0xff] }
  0x4d   :  { %583 = vmatprep.subr.mxu0 %v361_v46  ;;  %618 = vmatprep.subr.mxu1 %v393_v47  ;;  %v372_v5 = vld [vmem:[#allocation8 + $0x118] sm:$0xff]  ;;  %v371_v9 = vld [vmem:[#allocation8 + $0x110] sm:$0xff]  ;;  %v370_v13 = vld [vmem:[#allocation8 + $0x108] sm:$0xff] }
  0x4e   :  { %584 = vmatpush3.msra.mxu0 %v345_v48  ;;  %619 = vmatpush3.msra.mxu1 %v377_v49  ;;  %v353_v14 = vld [vmem:[#allocation8 + $0x80] sm:$0xff]  ;;  %v89_v22 = vld [vmem:[#allocation7] sm:$0xf] }
  0x4f   :  { %585 = vmatprep.subr.mxu0 %v360_v50  ;;  %620 = vmatprep.subr.mxu1 %v392_v51  ;;  %v385_v15 = vld [vmem:[#allocation8 + $0x180] sm:$0xff]  ;;  %v94_v25 = vrot.slane %v89_v22, %v93_v20  ;;  %v102_v26 = vrot.slane %v89_v22, %v101_v21  ;;  %v98_v27 = vrot.slane %v89_v22, %v97_v23 }
  0x50   :  { %586 = vmatpush3.msra.mxu0 %v344_v52  ;;  %621 = vmatpush3.msra.mxu1 %v376_v53  ;;  %v337_v16 = vld [vmem:[#allocation8] sm:$0xff]  ;;  %v106_v28 = vrot.slane %v89_v22, %v105_v24 }
  0x51   :  { %587 = vmatprep.subr.mxu0 %v359_v54  ;;  %622 = vmatprep.subr.mxu1 %v391_v55  ;;  %v369_v17 = vld [vmem:[#allocation8 + $0x100] sm:$0xff] }
  0x52   :  { %588 = vmatpush3.msra.mxu0 %v343_v56  ;;  %623 = vmatpush3.msra.mxu1 %v375_v57 }
  0x53   :  { %589 = vmatprep.subr.mxu0 %v358_v58  ;;  %624 = vmatprep.subr.mxu1 %v390_v59 }
  0x54   :  { %590 = vmatpush3.msra.mxu0 %v342_v60  ;;  %625 = vmatpush3.msra.mxu1 %v374_v61 }
  0x55   :  { %591 = vmatprep.subr.mxu0 %v357_v62  ;;  %626 = vmatprep.subr.mxu1 %v389_v63 }
  0x56   :  { %592 = vmatpush3.msra.mxu0 %v341_v0  ;;  %627 = vmatpush3.msra.mxu1 %v373_v1 }
  0x57   :  { %593 = vmatprep.subr.mxu0 %v356_v2  ;;  %628 = vmatprep.subr.mxu1 %v388_v3 }
  0x58   :  { %594 = vmatpush3.msra.mxu0 %v340_v4  ;;  %629 = vmatpush3.msra.mxu1 %v372_v5 }
  0x59   :  { %595 = vmatprep.subr.mxu0 %v355_v6  ;;  %630 = vmatprep.subr.mxu1 %v387_v7 }
  0x5a   :  { %596 = vmatpush3.msra.mxu0 %v339_v8  ;;  %631 = vmatpush3.msra.mxu1 %v371_v9 }
  0x5b   :  { %597 = vmatprep.subr.mxu0 %v354_v10  ;;  %632 = vmatprep.subr.mxu1 %v386_v11 }
  0x5c   :  { %598 = vmatpush3.msra.mxu0 %v338_v12  ;;  %633 = vmatpush3.msra.mxu1 %v370_v13 }
  0x5d   :  { %599 = vmatprep.subr.mxu0 %v353_v14  ;;  %634 = vmatprep.subr.mxu1 %v385_v15 }
  0x5e   :  { %600 = vmatpush3.msra.mxu0 %v337_v16  ;;  %635 = vmatpush3.msra.mxu1 %v369_v17 }
  0xfe   :  { %v181_v29 = vpop.f32.mrf.mxu0  ;;  %v252_v30 = vpop.f32.mrf.mxu1 }
  0xff   :  { %v182_v31 = vadd.f32 %v181_v29, %v94_v25  ;;  %v253_v32 = vadd.f32 %v252_v30, %v102_v26 }
 0x100   :  { %v183_v33 = vpop.f32.mrf.mxu0  ;;  %v254_v34 = vpop.f32.mrf.mxu1 }
 0x101   :  { %v257_v35 = vmax.f32 %v182_v31, 0.0  ;;  %v259_v36 = vmax.f32 %v253_v32, 0.0  ;;  %v184_v37 = vadd.f32 %v183_v33, %v98_v27  ;;  %v255_v38 = vadd.f32 %v254_v34, %v106_v28 }
 0x103   :  { %v261_v39 = vrot.slane %v257_v35, 4  ;;  %v273_v40 = vrot.slane %v259_v36, 4  ;;  %v258_v41 = vmax.f32 %v184_v37, 0.0  ;;  %v260_v42 = vmax.f32 %v255_v38, 0.0 }
 0x105   :  { %v262_v43 = vadd.f32 %v261_v39, %v257_v35  ;;  %v274_v44 = vadd.f32 %v273_v40, %v259_v36  ;;  %v267_v45 = vrot.slane %v258_v41, 4  ;;  %v279_v46 = vrot.slane %v260_v42, 4 }
 0x107   :  { %v263_v47 = vrot.slane %v262_v43, 2  ;;  %v275_v48 = vrot.slane %v274_v44, 2  ;;  %v268_v49 = vadd.f32 %v267_v45, %v258_v41  ;;  %v280_v50 = vadd.f32 %v279_v46, %v260_v42 }
 0x109   :  { %v264_v51 = vadd.f32 %v263_v47, %v262_v43  ;;  %v276_v52 = vadd.f32 %v275_v48, %v274_v44  ;;  %v269_v53 = vrot.slane %v268_v49, 2  ;;  %v281_v54 = vrot.slane %v280_v50, 2 }
 0x10b   :  { %v265_v55 = vrot.slane %v264_v51, 1  ;;  %v277_v56 = vrot.slane %v276_v52, 1  ;;  %v270_v57 = vadd.f32 %v269_v53, %v268_v49  ;;  %v282_v58 = vadd.f32 %v281_v54, %v280_v50 }
 0x10d   :  { %v266_v59 = vadd.f32 %v265_v55, %v264_v51  ;;  %v278_v60 = vadd.f32 %v277_v56, %v276_v52  ;;  %v271_v61 = vrot.slane %v270_v57, 1  ;;  %v283_v62 = vrot.slane %v282_v58, 1  ;;  %v568_v55 = vld [vmem:[%s827_s4] ss:$0 sm:$0xff] }
 0x10f   :  { %v285_v63 = vmul.f32 0.125, %v266_v59  ;;  %v287_v0 = vmul.f32 0.125, %v278_v60  ;;  %v272_v1 = vadd.f32 %v271_v61, %v270_v57  ;;  %v284_v2 = vadd.f32 %v283_v62, %v282_v58 }
 0x111   :  { %v289_v3 = vsub.f32 %v257_v35, %v285_v63  ;;  %v291_v4 = vsub.f32 %v259_v36, %v287_v0  ;;  %v286_v5 = vmul.f32 0.125, %v272_v1  ;;  %v288_v6 = vmul.f32 0.125, %v284_v2 }
 0x113   :  { %v293_v7 = vmul.f32 %v289_v3, %v289_v3  ;;  %v295_v8 = vmul.f32 %v291_v4, %v291_v4  ;;  %v290_v9 = vsub.f32 %v258_v41, %v286_v5  ;;  %v292_v10 = vsub.f32 %v260_v42, %v288_v6 }
 0x115   :  { %v297_v11 = vrot.slane %v293_v7, 4  ;;  %v309_v12 = vrot.slane %v295_v8, 4  ;;  %v294_v13 = vmul.f32 %v290_v9, %v290_v9  ;;  %v296_v14 = vmul.f32 %v292_v10, %v292_v10 }
 0x117   :  { %v298_v15 = vadd.f32 %v297_v11, %v293_v7  ;;  %v310_v16 = vadd.f32 %v309_v12, %v295_v8  ;;  %v303_v17 = vrot.slane %v294_v13, 4  ;;  %v315_v18 = vrot.slane %v296_v14, 4 }
 0x119   :  { %v299_v19 = vrot.slane %v298_v15, 2  ;;  %v311_v20 = vrot.slane %v310_v16, 2  ;;  %v304_v21 = vadd.f32 %v303_v17, %v294_v13  ;;  %v316_v22 = vadd.f32 %v315_v18, %v296_v14 }
 0x11b   :  { %v300_v23 = vadd.f32 %v299_v19, %v298_v15  ;;  %v312_v24 = vadd.f32 %v311_v20, %v310_v16  ;;  %v305_v25 = vrot.slane %v304_v21, 2  ;;  %v317_v26 = vrot.slane %v316_v22, 2 }
 0x11d   :  { %v301_v27 = vrot.slane %v300_v23, 1  ;;  %v313_v28 = vrot.slane %v312_v24, 1  ;;  %v306_v29 = vadd.f32 %v305_v25, %v304_v21  ;;  %v318_v30 = vadd.f32 %v317_v26, %v316_v22 }
 0x11f   :  { %v302_v31 = vadd.f32 %v301_v27, %v300_v23  ;;  %v314_v32 = vadd.f32 %v313_v28, %v312_v24  ;;  %v307_v33 = vrot.slane %v306_v29, 1  ;;  %v319_v34 = vrot.slane %v318_v30, 1 }
 0x121   :  { %v321_v35 = vmul.f32 0.125, %v302_v31  ;;  %v323_v36 = vmul.f32 0.125, %v314_v32  ;;  %v308_v37 = vadd.f32 %v307_v33, %v306_v29  ;;  %v320_v38 = vadd.f32 %v319_v34, %v318_v30 }
 0x123   :  { %v325_v39 = vadd.f32 1e-05, %v321_v35  ;;  %v327_v40 = vadd.f32 1e-05, %v323_v36  ;;  %v322_v41 = vmul.f32 0.125, %v308_v37  ;;  %v324_v42 = vmul.f32 0.125, %v320_v38 }
 0x125   :  { %649 = vrsqrt.f32 %v325_v39  ;;  %v326_v43 = vadd.f32 1e-05, %v322_v41  ;;  %v328_v44 = vadd.f32 1e-05, %v324_v42 }
 0x126   :  { %651 = vrsqrt.f32 %v327_v40 }
 0x127   :  { %653 = vrsqrt.f32 %v326_v43 }
 0x128   :  { %655 = vrsqrt.f32 %v328_v44 }
 0x132   :  { %v650_v45 = vpop.eup %649 }
 0x133   :  { %v652_v46 = vpop.eup %651  ;;  %v333_v51 = vmul.f32 %v650_v45, %v289_v3 }
 0x134   :  { %v654_v47 = vpop.eup %653  ;;  %v335_v52 = vmul.f32 %v652_v46, %v291_v4 }
 0x135   :  { %v656_v48 = vpop.eup %655  ;;  %v334_v49 = vmul.f32 %v654_v47, %v290_v9 }
 0x136   :  { %v336_v50 = vmul.f32 %v656_v48, %v292_v10 }
 0x137   :  { %472 = vmatprep.mubr.f32.mxu0 %v334_v49 }
 0x138   :  { %542 = vmatprep.mubr.f32.mxu1 %v336_v50  ;;  %473 = vmatmul.mubr.f32.vlgmr.msra.gmra.mxu0 %v333_v51 }
 0x139   :  { %543 = vmatmul.mubr.f32.vlgmr.msra.gmra.mxu1 %v335_v52 }
 0x1f8   :  { %v601_v53 = vpop.f32.mrf.mxu0 }
 0x1f9   :  { %v636_v54 = vpop.f32.mrf.mxu1 }
 0x1fa   :  { %v602_v56 = vpop.f32.mrf.mxu0 }
 0x1fb   :  { %v603_v57 = vadd.f32 %v602_v56, %v601_v53  ;;  %v637_v58 = vpop.f32.mrf.mxu1 }
 0x1fc   :  { %v638_v60 = vadd.f32 %v637_v58, %v636_v54 }
 0x1fd   :  { %v475_v59 = vadd.f32 %v603_v57, %v568_v55 }
 0x1ff   :  { %v545_v61 = vadd.f32 %v638_v60, %v475_v59 }
 0x201   :  { %548 = vst [vmem:[#allocation10] sm:$0xff] %v545_v61 }
 0x202   :  { %748 = shalt.err (!%p745_p10)
}
 0x203   :  { %558 = dma.vmem_to_hbm [thread:$0]  %s556_s16, 128, %s828_s5, [#allocation4]  }
 0x204   :  { %763 = dma.done.wait [#allocation4], 128  }
 0x205   :  { %764 = vsyncadd [#allocation4], 4294967168 }
 0x206   :  { %562 = vsyncpa [#allocation3], 1 }
 0x207   :  { %563 = vsyncpa [#allocation6], 1 }
 0x208   :  { %564 = vsyncpa [#allocation9], 1 }
 0x209   :  { %565 = vsyncpa [#allocation4], 1 }

</bundles_post_ra>
